<compile_context>
chip_gen: v5e
topology: v5e:2x2
jax: 0.10.0
libtpu: 0.0.40
codegen_flags: <defaults>
</compile_context>

<pallas_src>
import jax
import jax.numpy as jnp
from jax import lax
from jax.experimental import pallas as pl
from jax.experimental.pallas import tpu as pltpu


def _round_up(x, m):
    return ((x + m - 1) // m) * m


def _pick_tile(total, cap):
    """Largest multiple-of-128 divisor of `total` (itself a multiple of 128), <= cap."""
    best = 128
    d = 256
    while d <= min(total, cap):
        if total % d == 0:
            best = d
        d += 128
    return best


def _invariant_spec(shape, index_map):
    """BlockSpec for a grid-invariant operand: single-buffer it (pure VMEM saving)."""
    try:
        return pl.BlockSpec(shape, index_map, pipeline_mode=pl.Buffered(1))
    except (TypeError, AttributeError):   # older jax: fall back to default buffering
        return pl.BlockSpec(shape, index_map)


def _vmem_limit(est_bytes):
    """Explicit per-call VMEM budget (working set + headroom), capped for v7x 64 MiB/TC."""
    return int(min(40 * 1024 * 1024, max(16 * 1024 * 1024, 2 * est_bytes + 2 * 1024 * 1024)))


# ---------------------------------------------------------------------------
# Stage 0: Q projection kernel (scale + bias folded in by the wrapper).
# ---------------------------------------------------------------------------
def _proj_kernel(x_ref, w_ref, b_ref, o_ref):
    # x / w are already in the matmul dtype; bias is f32, accumulation is f32.
    o_ref[...] = (jnp.dot(x_ref[...], w_ref[...],
                          preferred_element_type=jnp.float32)
                  + b_ref[...]).astype(o_ref.dtype)


# ---------------------------------------------------------------------------
# Stage 1: fused K/V projection kernel, tiled over N2.
# ---------------------------------------------------------------------------
def _kv_proj_kernel(x2_ref, wk_ref, bk_ref, wv_ref, bv_ref, k2_ref, v2_ref):
    x2 = x2_ref[...]
    k2_ref[...] = (jnp.dot(x2, wk_ref[...], preferred_element_type=jnp.float32)
                   + bk_ref[...]).astype(k2_ref.dtype)
    v2_ref[...] = (jnp.dot(x2, wv_ref[...], preferred_element_type=jnp.float32)
                   + bv_ref[...]).astype(v2_ref.dtype)


# ---------------------------------------------------------------------------
# Stage 2: attention kernel, grid = (B tiles, N2 chunks), online softmax over N2.
# ---------------------------------------------------------------------------
def _make_attn_kernel(n2_valid, block_kv, needs_mask, exp_dtype, approx_recip):
    def kernel(q_ref, k2_ref, v2_ref, wo_ref, bo_ref, out_ref, m_ref, l_ref, acc_ref):
        j = pl.program_id(1)

        @pl.when(j == 0)
        def _init():
            m_ref[...] = jnp.full_like(m_ref, -jnp.inf)
            l_ref[...] = jnp.zeros_like(l_ref)
            acc_ref[...] = jnp.zeros_like(acc_ref)

        k2 = k2_ref[...]
        v2 = v2_ref[...]

        # (tm, tk) logits: contract last dims directly (no transpose on the MXU path).
        logits = lax.dot_general(q_ref[...], k2, (((1,), (1,)), ((), ())),
                                 preferred_element_type=jnp.float32)
        if needs_mask:
            # Padded key rows of k2 contain +bk -> must be excluded from the softmax.
            key_idx = j * block_kv + lax.broadcasted_iota(jnp.int32, logits.shape, 1)
            logits = jnp.where(key_idx < n2_valid, logits, jnp.float32(-1e30))

        # Online (flash-style) softmax update. exp() runs in exp_dtype (bf16 EUP on
        # v6e/v7x when matmul_dtype=bf16); running stats stay f32.
        m_prev = m_ref[...]
        m_new = jnp.maximum(m_prev, jnp.max(logits, axis=-1, keepdims=True))
        alpha = jnp.exp(m_prev - m_new)
        p = jnp.exp((logits - m_new).astype(exp_dtype))
        l_ref[...] = alpha * l_ref[...] + jnp.sum(p.astype(jnp.float32), axis=-1,
                                                  keepdims=True)
        acc_ref[...] = alpha * acc_ref[...] + jnp.dot(
            p.astype(v2.dtype), v2, preferred_element_type=jnp.float32)
        m_ref[...] = m_new

        # Per-B-tile epilogue: normalize and apply the output projection once.
        @pl.when(j == pl.num_programs(1) - 1)
        def _finalize():
            if approx_recip:
                ctx = acc_ref[...] * pl.reciprocal(l_ref[...], approx=True)
            else:
                ctx = acc_ref[...] / l_ref[...]          # exact divide on the f32 path
            out = jnp.dot(ctx.astype(wo_ref.dtype), wo_ref[...],
                          preferred_element_type=jnp.float32) + bo_ref[...]
            out_ref[...] = out.astype(out_ref.dtype)

    return kernel


# ---------------------------------------------------------------------------
# Wrapper: padding, pre-casting, tiling, pallas_call plumbing.
# ---------------------------------------------------------------------------
def cross_attention(x1, x2, params, *, matmul_dtype=jnp.bfloat16,
                    block_m=256, block_kv=512):
    """x1: (B, in_dim1), x2: (N2, in_dim2). Returns (B, in_dim1) in x1.dtype."""
    wq, bq, wk, bk, wv, bv, wo, bo = params
    B, in_dim1 = x1.shape
    N2, in_dim2 = x2.shape
    k_dim = wq.shape[1]
    v_dim = wv.shape[1]

    f32 = jnp.float32
    matmul_dtype = jnp.dtype(matmul_dtype)
    itemsize = matmul_dtype.itemsize

    # Lane-dense (multiple-of-128) zero padding of every feature dim: exact math.
    d1 = _round_up(in_dim1, 128)
    d2 = _round_up(in_dim2, 128)
    dk = _round_up(k_dim, 128)
    dv = _round_up(v_dim, 128)

    # B tiles: ensure >= 2 tiles whenever B allows it so the "parallel" B axis can
    # shard across both TensorCores on v7x (harmless on single-TC v5e/v6e).
    Bp8 = _round_up(B, 8)
    tm = min(block_m, Bp8)
    if 8 < Bp8 <= block_m:
        tm = _round_up(pl.cdiv(Bp8, 2), 8)
    Bp = _round_up(Bp8, tm)
    nb = Bp // tm

    # kv chunking: when K2/V2 (+ per-step logits) fit comfortably in VMEM, use a single
    # kv step (tk = Np) -> no key padding for N2 % 128 == 0, and K2/V2 are fetched once
    # and stay resident instead of being re-streamed per B tile.
    Np = _round_up(N2, 128)
    resident_bytes = Np * (dk + dv) * itemsize + 2 * tm * Np * 4
    tk = Np if resident_bytes <= 8 * 1024 * 1024 else _pick_tile(Np, block_kv)
    nkv = Np // tk
    needs_mask = Np > N2                 # mask tied to the actual key-padding condition
    tkv = _pick_tile(Np, 512)            # row tile for the K/V projection stage

    scale = 1.0 / (8.0 ** 0.5)           # fixed /sqrt(8) scale from the torch module

    # Pre-cast weights/activations to the matmul dtype at padding time (biases stay f32):
    # halves DMA bytes + VMEM per block, removes all in-kernel weight casts.
    # TODO(synk): hoist the weight padding/casting out of the per-call path when the same
    #             params are reused across many calls.
    def pad2(a, rows, cols, dtype):
        return jnp.pad(a, ((0, rows - a.shape[0]), (0, cols - a.shape[1]))).astype(dtype)

    x1p = pad2(x1, Bp, d1, matmul_dtype)
    x2p = pad2(x2, Np, d2, matmul_dtype)
    wqp = pad2(wq * scale, d1, dk, matmul_dtype)      # softmax scale folded into Wq / bq
    bqp = pad2(bq * scale, 1, dk, f32)
    wkp, bkp = pad2(wk, d2, dk, matmul_dtype), pad2(bk, 1, dk, f32)
    wvp, bvp = pad2(wv, d2, dv, matmul_dtype), pad2(bv, 1, dv, f32)
    wop, bop = pad2(wo, dv, d1, matmul_dtype), pad2(bo, 1, d1, f32)

    # Explicit VMEM budgets: double-buffered streaming blocks + single-buffered weights
    # + scratch (+ live logits/p headroom for stage 2).
    est_q = (2 * tm * d1 + d1 * dk + 2 * tm * dk) * itemsize + dk * 4
    est_kv = (2 * tkv * d2 + d2 * (dk + dv) + 2 * tkv * (dk + dv)) * itemsize \
        + (dk + dv) * 4
    kv_buf = 1 if nkv == 1 else 2
    est_attn = (2 * tm * dk + kv_buf * tk * (dk + dv) + dv * d1) * itemsize \
        + 2 * tm * d1 * 4 + d1 * 4 + tm * (dv + 2) * 4 + 2 * tm * tk * 4

    cp_q = pltpu.CompilerParams(dimension_semantics=("parallel",),
                                vmem_limit_bytes=_vmem_limit(est_q))
    cp_kv = pltpu.CompilerParams(dimension_semantics=("parallel",),
                                 vmem_limit_bytes=_vmem_limit(est_kv))
    cp_attn = pltpu.CompilerParams(dimension_semantics=("parallel", "arbitrary"),
                                   vmem_limit_bytes=_vmem_limit(est_attn))

    # --- Stage 0: Q projection (bias + softmax scale folded in), tiled over B. ---
    q = pl.pallas_call(
        _proj_kernel,
        out_shape=jax.ShapeDtypeStruct((Bp, dk), matmul_dtype),
        grid_spec=pltpu.PrefetchScalarGridSpec(
            num_scalar_prefetch=0,
            grid=(nb,),
            in_specs=[
                pl.BlockSpec((tm, d1), lambda i: (i, 0)),        # x1 tile
                _invariant_spec((d1, dk), lambda i: (0, 0)),     # Wq (scaled)
                _invariant_spec((1, dk), lambda i: (0, 0)),      # bq (scaled, f32)
            ],
            out_specs=pl.BlockSpec((tm, dk), lambda i: (i, 0))),
        compiler_params=cp_q,
    )(x1p, wqp, bqp)

    # --- Stage 1: shared K/V projections, computed once (tiled over N2). ---
    k2, v2 = pl.pallas_call(
        _kv_proj_kernel,
        out_shape=(jax.ShapeDtypeStruct((Np, dk), matmul_dtype),
                   jax.ShapeDtypeStruct((Np, dv), matmul_dtype)),
        grid_spec=pltpu.PrefetchScalarGridSpec(
            num_scalar_prefetch=0,
            grid=(Np // tkv,),
            in_specs=[
                pl.BlockSpec((tkv, d2), lambda i: (i, 0)),       # x2 chunk
                _invariant_spec((d2, dk), lambda i: (0, 0)),     # Wk
                _invariant_spec((1, dk), lambda i: (0, 0)),      # bk (f32)
                _invariant_spec((d2, dv), lambda i: (0, 0)),     # Wv
                _invariant_spec((1, dv), lambda i: (0, 0)),      # bv (f32)
            ],
            out_specs=[
                pl.BlockSpec((tkv, dk), lambda i: (i, 0)),
                pl.BlockSpec((tkv, dv), lambda i: (i, 0)),
            ]),
        compiler_params=cp_kv,
    )(x2p, wkp, bkp, wvp, bvp)

    # --- Stage 2: flash-style cross attention + fused output projection. ---
    approx_recip = itemsize < 4          # exact divide on the f32 path (tight tolerance)
    attn_kernel = _make_attn_kernel(N2, tk, needs_mask, matmul_dtype, approx_recip)

    if nkv == 1:                         # K2/V2 grid-invariant -> single-buffer them too
        k2_spec = _invariant_spec((tk, dk), lambda i, j: (j, 0))
        v2_spec = _invariant_spec((tk, dv), lambda i, j: (j, 0))
    else:
        k2_spec = pl.BlockSpec((tk, dk), lambda i, j: (j, 0))
        v2_spec = pl.BlockSpec((tk, dv), lambda i, j: (j, 0))

    outp = pl.pallas_call(
        attn_kernel,
        out_shape=jax.ShapeDtypeStruct((Bp, d1), x1.dtype),
        grid_spec=pltpu.PrefetchScalarGridSpec(
            num_scalar_prefetch=0,
            grid=(nb, nkv),
            in_specs=[
                pl.BlockSpec((tm, dk), lambda i, j: (i, 0)),      # q tile (resident over kv)
                k2_spec,                                          # k2 chunk
                v2_spec,                                          # v2 chunk
                _invariant_spec((dv, d1), lambda i, j: (0, 0)),   # Wo
                _invariant_spec((1, d1), lambda i, j: (0, 0)),    # bo (f32)
            ],
            out_specs=pl.BlockSpec((tm, d1), lambda i, j: (i, 0)),
            scratch_shapes=[
                pltpu.VMEM((tm, 1), jnp.float32),    # running max
                pltpu.VMEM((tm, 1), jnp.float32),    # running denominator
                pltpu.VMEM((tm, dv), jnp.float32),   # output accumulator
            ]),
        compiler_params=cp_attn,
    )(q, k2, v2, wop, bop)

    return outp[:B, :in_dim1]


# ---------------------------------------------------------------------------
# Params + pure-JAX reference.
# ---------------------------------------------------------------------------
def init_params(key, in_dim1, in_dim2, k_dim, v_dim, dtype=jnp.float32):
    """Deterministic synthetic Linear params, stored as (in, out) + (1, out)."""
    ks = jax.random.split(key, 8)

    def lin(kw, kb, fan_in, fan_out):
        bound = 1.0 / (fan_in ** 0.5)
        w = jax.random.uniform(kw, (fan_in, fan_out), dtype, -bound, bound)
        b = jax.random.uniform(kb, (1, fan_out), dtype, -bound, bound)
        return w, b

    wq, bq = lin(ks[0], ks[1], in_dim1, k_dim)
    wk, bk = lin(ks[2], ks[3], in_dim2, k_dim)
    wv, bv = lin(ks[4], ks[5], in_dim2, v_dim)
    wo, bo = lin(ks[6], ks[7], v_dim, in_dim1)
    return (wq, bq, wk, bk, wv, bv, wo, bo)


def cross_attention_ref(x1, x2, params):
    """Pure-JAX reference mirroring the PyTorch forward (mask=None)."""
    wq, bq, wk, bk, wv, bv, wo, bo = params
    q1 = x1 @ wq + bq
    k2 = x2 @ wk + bk
    v2 = x2 @ wv + bv
    attn = (q1 @ k2.T) / (8.0 ** 0.5)
    attn = jax.nn.softmax(attn, axis=-1)
    out = attn @ v2
    return out @ wo + bo


if __name__ == "__main__":
    key = jax.random.PRNGKey(0)
    k_big, k_small = jax.random.split(key, 2)

    # --- Case 1: MXU-aligned shapes, bf16 matmul path, 2 B tiles x 1 resident kv step. ---
    B, N2 = 512, 384
    in_dim1, in_dim2, k_dim, v_dim = 128, 128, 128, 128
    kx1, kx2, kp = jax.random.split(k_big, 3)
    x1 = jax.random.normal(kx1, (B, in_dim1), jnp.float32)
    x2 = jax.random.normal(kx2, (N2, in_dim2), jnp.float32)
    params = init_params(kp, in_dim1, in_dim2, k_dim, v_dim)

    out = jax.block_until_ready(cross_attention(x1, x2, params))
    ref = cross_attention_ref(x1, x2, params)
    assert out.shape == (B, in_dim1)
    assert jnp.allclose(out, ref, atol=5e-2, rtol=5e-2), "bf16 path mismatch vs reference"

    # --- Case 2: tiny unaligned shapes from the original module, f32 matmul path. ---
    Bs, N2s = 8, 8
    d1s, d2s, kds, vds = 32, 16, 32, 32
    ka, kb, kc = jax.random.split(k_small, 3)
    x1s = jax.random.normal(ka, (Bs, d1s), jnp.float32)
    x2s = jax.random.normal(kb, (N2s, d2s), jnp.float32)
    params_s = init_params(kc, d1s, d2s, kds, vds)

    out_s = jax.block_until_ready(
        cross_attention(x1s, x2s, params_s, matmul_dtype=jnp.float32))
    ref_s = cross_attention_ref(x1s, x2s, params_s)
    assert out_s.shape == (Bs, d1s)
    assert jnp.allclose(out_s, ref_s, atol=2e-3, rtol=2e-3), "f32 path mismatch vs reference"

    print("KERNEL_OK")
</pallas_src>

<mosaic_0001>
module attributes {stable_mosaic.version = 11 : i64} {
  func.func @_proj_kernel(%arg0: i32, %arg1: memref<256x128xbf16, #tpu.memory_space<vmem>>, %arg2: memref<128x128xbf16, #tpu.memory_space<vmem>>, %arg3: memref<1x128xf32, #tpu.memory_space<vmem>>, %arg4: memref<256x128xbf16, #tpu.memory_space<vmem>>) attributes {dimension_semantics = [#tpu.dimension_semantics<parallel>], iteration_bounds = array<i64: 2>, scalar_prefetch = 0 : i64, scratch_operands = 0 : i64, tpu.core_type = #tpu.core_type<tc>, window_params = [{transform_indices = @transform_0, window_bounds = array<i64: 256, 128>}, {pipeline_mode = #tpu.pipeline_mode<synchronous>, transform_indices = @transform_1, window_bounds = array<i64: 128, 128>}, {pipeline_mode = #tpu.pipeline_mode<synchronous>, transform_indices = @transform_2, window_bounds = array<i64: 1, 128>}, {transform_indices = @transform_3, window_bounds = array<i64: 256, 128>}]} {
    %c0 = arith.constant 0 : index
    %c0_0 = arith.constant 0 : index
    %0 = vector.load %arg1[%c0, %c0_0] : memref<256x128xbf16, #tpu.memory_space<vmem>>, vector<256x128xbf16>
    %c0_1 = arith.constant 0 : index
    %c0_2 = arith.constant 0 : index
    %1 = vector.load %arg2[%c0_1, %c0_2] : memref<128x128xbf16, #tpu.memory_space<vmem>>, vector<128x128xbf16>
    %cst = arith.constant dense<0.000000e+00> : vector<256x128xf32>
    %2 = tpu.matmul %0, %1, %cst {dimension_numbers = #tpu.dot_dimension_numbers<[1], [0], [0], [1], [0, 0, 1, 1], [], []>} : vector<256x128xbf16>, vector<128x128xbf16>, vector<256x128xf32> -> vector<256x128xf32>
    %c0_3 = arith.constant 0 : index
    %c0_4 = arith.constant 0 : index
    %3 = vector.load %arg3[%c0_3, %c0_4] : memref<1x128xf32, #tpu.memory_space<vmem>>, vector<1x128xf32>
    %4 = vector.broadcast %3 : vector<1x128xf32> to vector<256x128xf32>
    %5 = arith.addf %2, %4 : vector<256x128xf32>
    %6 = arith.truncf %5 : vector<256x128xf32> to vector<256x128xbf16>
    %c0_5 = arith.constant 0 : index
    %c0_6 = arith.constant 0 : index
    %7 = vector.load %arg4[%c0_5, %c0_6] : memref<256x128xbf16, #tpu.memory_space<vmem>>, vector<256x128xbf16>
    tpu.vector_store %arg4[%c0_5, %c0_6], %6 {strides = array<i32>} : memref<256x128xbf16, #tpu.memory_space<vmem>>, vector<256x128xbf16>,
    return
  }
  func.func @transform_0(%arg0: i32) -> (i32, i32) {
    %c0_i32 = arith.constant 0 : i32
    %c0_i32_0 = arith.constant 0 : i32
    return %arg0, %c0_i32 : i32, i32
  }
  func.func @transform_1(%arg0: i32) -> (i32, i32) {
    %c0_i32 = arith.constant 0 : i32
    %c0_i32_0 = arith.constant 0 : i32
    %c0_i32_1 = arith.constant 0 : i32
    return %c0_i32, %c0_i32_0 : i32, i32
  }
  func.func @transform_2(%arg0: i32) -> (i32, i32) {
    %c0_i32 = arith.constant 0 : i32
    %c0_i32_0 = arith.constant 0 : i32
    %c0_i32_1 = arith.constant 0 : i32
    return %c0_i32, %c0_i32_0 : i32, i32
  }
  func.func @transform_3(%arg0: i32) -> (i32, i32) {
    %c0_i32 = arith.constant 0 : i32
    %c0_i32_0 = arith.constant 0 : i32
    return %arg0, %c0_i32 : i32, i32
  }
}

</mosaic_0001>

<bundles_post_ra>
// kernel: tpu_custom_call.1
= control target key start
LH: loop header
LB: loop body
LE: loop exit
PB: predicated region body
PF: predicated region fallthrough
CT: control target
= control target key end

     0   :  { %8 = vsyncpa [#allocation3], 0  ;;  %s1356_s0 = inlined_call_operand.hbm [shape: bf16[512,128], index: 0, kind: input, shape index: {}]   ;;  %s1357_s1 = inlined_call_operand.hbm [shape: bf16[128,128], index: 1, kind: input, shape index: {}]   ;;  %s1358_s2 = inlined_call_operand.vmem [shape: f32[1,128], index: 2, kind: input, shape index: {}]   ;;  %s1359_s3 = inlined_call_operand.hbm [shape: bf16[512,128], index: 3, kind: output, shape index: {}]  }
   0x1   :  { %10 = vsyncpa [#allocation3 + $0x1], 0 }
   0x2   :  { %11 = vsyncpa [#allocation6], 0 }
   0x3   :  { %12 = vsyncpa [#allocation4], 0 }
   0x4   :  { %14 = vsyncpa [#allocation4 + $0x1], 0  ;;  %s1134_s12 = smov 0   ;;  %s1136_s13 = smov 0  }
   0x5   :  { %s1138_s14 = smov 0   ;;  %s1140_s15 = smov 0  }
   0x6 LB: > { %s1155_s16 = sadd.s32 4294967295, %s1107_s15   ;;  %s658_s17 = sadd.s32 4294967294, %s1107_s15   ;;  %s1107_s15 = sphi %s1140_s15, %s1369_s15   ;;  %s1103_s14 = sphi %s1138_s14, %s1368_s14   ;;  %s1099_s13 = sphi %s1136_s13, %s1367_s13   ;;  %s1095_s12 = sphi %s1134_s12, %s1366_s12  }
   0x7   : > { %p40_p0 = scmp.ne.s32.totalorder %s1099_s13, %s1095_s12  ;;  %p41_p1 = scmp.eq.s32.totalorder %s1155_s16, 0 }
   0x8   : > { %p106_p2 = scmp.eq.s32.totalorder %s1155_s16, 1  ;;  %p112_p3 = scmp.eq.s32.totalorder %s658_s17, 1 }
   0x9   : > { %p1164_p4 = por %p41_p1, %p40_p0  ;;  %p659_p5 = scmp.ge.s32.totalorder %s1107_s15, 1 }
   0xa   : > { %p1169_p6 = por %p112_p3, %p40_p0  ;;  %p119_p7 = scmp.lt.s32.totalorder %s1107_s15, 3 }
   0xb   : > { %s130_s22 = sshll.u32 %s1357_s1, 4  ;;  %s1109_s24 = smov [#allocation5]   ;;  %s131_s22 = int_to_ptr.hbm [resolvable:$true] %s130_s22 }
   0xc   : > { %p1177_p8 = pnand %p659_p5, %p119_p7  ;;  %s132_s25 = sshll.u32 %s1109_s24, 4  ;;  %s133_s25 = int_to_ptr.vmem [resolvable:$true] %s132_s25 }
   0xd   : > { %s1187_s26 = sadd.s32 1, %s1107_s15   ;;  %s1110_s27 = smov 64  }
   0xe   : > { %p923_p9 = pneg %p1177_p8  ;;  %s1111_s28 = smov 4  }
   0xf   : > { %s24_s29 = ssub.s32 %s1107_s15, %s1187_s26  ;;  %s27_s30 = sadd.s32 1, %s1103_s14 }
  0x10   : > { %p924_p10 = pnand %p923_p9, %p41_p1  ;;  %p25_p12 = scmp.eq.s32.totalorder %s24_s29, 0 }
  0x11   : > { %p34_p13 = scmp.ne.s32.totalorder %s1103_s14, %s1099_s13  ;;  %p35_p0 = scmp.eq.s32.totalorder %s1107_s15, 0 }
  0x12   : > { %926 = dma.hbm_to_vmem [thread:$0]  (!%p924_p10), %s131_s22, 1024, %s133_s25, [#allocation6], %s1110_s27, %s1110_s27, %s1111_s28  }
  0x13   : > { %s1199_s4 = scalar_select %p25_p12, %s1103_s14, %s27_s30  }
  0x14   : > { %p1203_p3 = por %p106_p2, %p34_p13  ;;  %p936_p5 = scmp.lt.s32.totalorder %s1107_s15, 2 }
  0x15   : > { %s149_s6 = sand.u32 1, %s1103_s14   ;;  %s770_s7 = sshll.u32 %s1107_s15, 7 }
  0x16   : > { %p36_p7 = por %p35_p0, %p34_p13  ;;  %s662_s8 = sshll.u32 %s149_s6, 7 }
  0x17   : > { %s158_s11 = scalar_lea.hbm %s1356_s0, %s770_s7  ;;  %s153_s20 = scalar_lea.vmem [#allocation2], %s662_s8 }
  0x18   : > { %s159_s17 = sshll.u32 %s158_s11, 4  ;;  %s161_s21 = sshll.u32 %s153_s20, 4  ;;  %s160_s17 = int_to_ptr.hbm [resolvable:$true] %s159_s17  ;;  %s162_s21 = int_to_ptr.vmem [resolvable:$true] %s161_s21 }
  0x19   : > { %p1213_p9 = pnand %p936_p5, %p36_p7  ;;  %s150_s24 = scalar_lea.sflag [#allocation3], %s149_s6 }
  0x1a   : > { %s1007_s25 = sshra.s32 %s160_s17, 4  ;;  %s1014_s8 = scalar_lea.hbm %s1356_s0, 256  ;;  %s1008_s25 = int_to_ptr.hbm [resolvable:$true] %s1007_s25 }
  0x1b   : > { %s1009_s29 = scalar_lea.hbm %s1008_s25, 128  ;;  %p1011_p10 = pneg %p1213_p9 }
  0x1c   : > { %p1010_p2 = scmp.ne.s32.totalorder %s1008_s25, %s1009_s29  ;;  %p1015_p0 = scmp.lt.s32.totalorder %s1008_s25, %s1356_s0 }
  0x1d   : > { %p1016_p5 = scmp.lt.s32.totalorder %s1014_s8, %s1009_s29 }
  0x1e   : > { %p1012_p12 = pnand %p1011_p10, %p1010_p2 }
  0x1f   : > { %p1017_p7 = por %p1016_p5, %p1015_p0 }
  0x20   : > { %p1013_p13 = pneg %p1012_p12 }
  0x22   : > { %p1018_p11 = pnand %p1017_p7, %p1013_p13 }
  0x24   : > { %1021 = shalt.err (!%p1018_p11)
}
  0x25   : > { %930 = dma.hbm_to_vmem [thread:$0]  (!%p1213_p9), %s160_s17, 2048, %s162_s21, %s150_s24, %s1110_s27, %s1110_s27, %s1111_s28  }
  0x26   : > { %173 = sbr.rel (%p1177_p8) target bundleno = 276 (0x114), region = 32  ;;  %s1233_s6 = sand.u32 (!%p1177_p8), 1, %s1099_s13  }
  0x27   : > { %s666_s11 = sshll.u32 (!%p1177_p8), %s1233_s6, 7  ;;  %s176_s20 = scalar_lea.sflag (!%p1177_p8), [#allocation3], %s1233_s6 }
  0x28   : > { %s1239_s25 = scalar_lea.vmem (!%p1177_p8), [#allocation2], %s666_s11 }
  0x2b   : > { %1082 = dma.done.wait (%p1164_p4), %s176_s20, 2048  }
  0x2c   : > { %1084 = vsyncadd (%p1164_p4), %s176_s20, 4294965248 }
  0x2d   : > { %1086 = dma.done.wait (%p41_p1), [#allocation6], 1024  }
  0x2e   : > { %1088 = vsyncadd (%p41_p1), [#allocation6], 4294966272  ;;  %v794_v0 = vld [vmem:[#allocation5 + $0x38] sm:$0xff]  ;;  %v793_v1 = vld [vmem:[#allocation5 + $0x30] sm:$0xff]  ;;  %s1276_s27 = scalar_lea.vmem [#allocation7], %s666_s11  ;;  %s795_s28 = sshll.u32 %s1155_s16, 7 }
  0x2f   : > { %406 = vmatpush.bf16.msra.mxu0 %v794_v0  ;;  %891 = vmatpush.bf16.msra.mxu1 %v794_v0  ;;  %v792_v2 = vld [vmem:[#allocation5 + $0x28] sm:$0xff]  ;;  %v791_v3 = vld [vmem:[#allocation5 + $0x20] sm:$0xff]  ;;  %v790_v4 = vld [vmem:[#allocation5 + $0x18] sm:$0xff]  ;;  %s571_s22 = scalar_lea.hbm %s1359_s3, %s795_s28  ;;  %s572_s24 = sshll.u32 %s1276_s27, 4  ;;  %s573_s24 = int_to_ptr.vmem [resolvable:$true] %s572_s24 }
  0x30   : > { %892 = vmatpush.bf16.msra.mxu2 %v794_v0  ;;  %893 = vmatpush.bf16.msra.mxu3 %v794_v0  ;;  %v789_v5 = vld [vmem:[#allocation5 + $0x10] sm:$0xff]  ;;  %v788_v6 = vld [vmem:[#allocation5 + $0x8] sm:$0xff]  ;;  %v787_v7 = vld [vmem:[#allocation5] sm:$0xff]  ;;  %s574_s29 = sshll.u32 %s571_s22, 4  ;;  %s560_s16 = scalar_lea.sflag [#allocation4], %s1233_s6  ;;  %s575_s29 = int_to_ptr.hbm [resolvable:$true] %s574_s29 }
  0x31   : > { %v771_v8 = vld [vmem:[%s1239_s25] sm:$0xff]  ;;  %v772_v12 = vld [vmem:[%s1239_s25 + $0x8] sm:$0xff]  ;;  %v773_v16 = vld [vmem:[%s1239_s25 + $0x10] sm:$0xff]  ;;  %s1051_s30 = sshra.s32 %s575_s29, 4  ;;  %s1057_s10 = scalar_lea.hbm %s1359_s3, 256  ;;  %s1052_s30 = int_to_ptr.hbm [resolvable:$true] %s1051_s30 }
  0x32   : > { %v775_v9 = vld [vmem:[%s1239_s25 + $0x20] sm:$0xff]  ;;  %v776_v13 = vld [vmem:[%s1239_s25 + $0x28] sm:$0xff]  ;;  %v777_v17 = vld [vmem:[%s1239_s25 + $0x30] sm:$0xff]  ;;  %s1053_s7 = scalar_lea.hbm %s1052_s30, 128  ;;  %p1058_p11 = scmp.lt.s32.totalorder %s1052_s30, %s1359_s3 }
  0x33   : > { %407 = vmatpush.bf16.msra.mxu0 %v793_v1  ;;  %894 = vmatpush.bf16.msra.mxu1 %v793_v1  ;;  %v779_v10 = vld [vmem:[%s1239_s25 + $0x40] sm:$0xff]  ;;  %v780_v14 = vld [vmem:[%s1239_s25 + $0x48] sm:$0xff]  ;;  %v781_v18 = vld [vmem:[%s1239_s25 + $0x50] sm:$0xff]  ;;  %p1054_p1 = scmp.ne.s32.totalorder %s1052_s30, %s1053_s7  ;;  %p1059_p9 = scmp.lt.s32.totalorder %s1057_s10, %s1053_s7 }
  0x34   : > { %895 = vmatpush.bf16.msra.mxu2 %v793_v1  ;;  %896 = vmatpush.bf16.msra.mxu3 %v793_v1  ;;  %v783_v11 = vld [vmem:[%s1239_s25 + $0x60] sm:$0xff]  ;;  %v784_v15 = vld [vmem:[%s1239_s25 + $0x68] sm:$0xff]  ;;  %v785_v19 = vld [vmem:[%s1239_s25 + $0x70] sm:$0xff] }
  0x35   : > { %v774_v20 = vld [vmem:[%s1239_s25 + $0x18] sm:$0xff]  ;;  %v1268_v26 = vld [vmem:[%s1358_s2] ss:$0 sm:$0xff]  ;;  %p1055_p4 = pnand %p1054_p1, %p1203_p3  ;;  %p1060_p2 = por %p1059_p9, %p1058_p11 }
  0x36   : > { %v778_v21 = vld [vmem:[%s1239_s25 + $0x38] sm:$0xff] }
  0x37   : > { %408 = vmatpush.bf16.msra.mxu0 %v792_v2  ;;  %897 = vmatpush.bf16.msra.mxu1 %v792_v2  ;;  %v782_v22 = vld [vmem:[%s1239_s25 + $0x58] sm:$0xff]  ;;  %p1056_p8 = pneg %p1055_p4 }
  0x38   : > { %898 = vmatpush.bf16.msra.mxu2 %v792_v2  ;;  %899 = vmatpush.bf16.msra.mxu3 %v792_v2  ;;  %v786_v23 = vld [vmem:[%s1239_s25 + $0x78] sm:$0xff] }
  0x39   : > { %p1061_p10 = pnand %p1060_p2, %p1056_p8 }
  0x3b   : > { %409 = vmatpush.bf16.msra.mxu0 %v791_v3  ;;  %900 = vmatpush.bf16.msra.mxu1 %v791_v3 }
  0x3c   : > { %901 = vmatpush.bf16.msra.mxu2 %v791_v3  ;;  %902 = vmatpush.bf16.msra.mxu3 %v791_v3 }
  0x3f   : > { %410 = vmatpush.bf16.msra.mxu0 %v790_v4  ;;  %903 = vmatpush.bf16.msra.mxu1 %v790_v4 }
  0x40   : > { %904 = vmatpush.bf16.msra.mxu2 %v790_v4  ;;  %905 = vmatpush.bf16.msra.mxu3 %v790_v4 }
  0x43   : > { %411 = vmatpush.bf16.msra.mxu0 %v789_v5  ;;  %906 = vmatpush.bf16.msra.mxu1 %v789_v5 }
  0x44   : > { %907 = vmatpush.bf16.msra.mxu2 %v789_v5  ;;  %908 = vmatpush.bf16.msra.mxu3 %v789_v5 }
  0x47   : > { %412 = vmatpush.bf16.msra.mxu0 %v788_v6  ;;  %909 = vmatpush.bf16.msra.mxu1 %v788_v6 }
  0x48   : > { %910 = vmatpush.bf16.msra.mxu2 %v788_v6  ;;  %911 = vmatpush.bf16.msra.mxu3 %v788_v6 }
  0x4b   : > { %413 = vmatpush.bf16.msra.mxu0 %v787_v7  ;;  %912 = vmatpush.bf16.msra.mxu1 %v787_v7 }
  0x4c   : > { %913 = vmatpush.bf16.msra.mxu2 %v787_v7  ;;  %914 = vmatpush.bf16.msra.mxu3 %v787_v7 }
  0x4e   : > { %414 = vmatmul.bf16.vlgmr.msra.gmra.mxu0 %v771_v8  ;;  %434 = vmatmul.bf16.vlgmr.msra.gmra.mxu1 %v775_v9 }
  0x4f   : > { %454 = vmatmul.bf16.vlgmr.msra.gmra.mxu2 %v779_v10  ;;  %474 = vmatmul.bf16.vlgmr.msra.gmra.mxu3 %v783_v11 }
  0x5e   : > { %419 = vmatmul.bf16.gmra.mxu0 %v772_v12  ;;  %439 = vmatmul.bf16.gmra.mxu1 %v776_v13 }
  0x5f   : > { %459 = vmatmul.bf16.gmra.mxu2 %v780_v14  ;;  %479 = vmatmul.bf16.gmra.mxu3 %v784_v15 }
  0x6e   : > { %424 = vmatmul.bf16.gmra.mxu0 %v773_v16  ;;  %444 = vmatmul.bf16.gmra.mxu1 %v777_v17 }
  0x6f   : > { %464 = vmatmul.bf16.gmra.mxu2 %v781_v18  ;;  %484 = vmatmul.bf16.gmra.mxu3 %v785_v19 }
  0x7e   : > { %429 = vmatmul.bf16.gmra.mxu0 %v774_v20  ;;  %449 = vmatmul.bf16.gmra.mxu1 %v778_v21 }
  0x7f   : > { %469 = vmatmul.bf16.gmra.mxu2 %v782_v22  ;;  %489 = vmatmul.bf16.gmra.mxu3 %v786_v23 }
  0xcb   : > { %v415_v24 = vpop.f32.mrf.mxu0  ;;  %v435_v25 = vpop.f32.mrf.mxu1 }
  0xcc   : > { %v416_v31 = vadd.f32 %v1268_v26, %v415_v24  ;;  %v436_v32 = vadd.f32 %v1268_v26, %v435_v25 }
  0xd2   : > { %v455_v27 = vpop.f32.mrf.mxu2  ;;  %v475_v28 = vpop.f32.mrf.mxu3 }
  0xd3   : > { %v417_v29 = vpop.f32.mrf.mxu0  ;;  %v437_v30 = vpop.f32.mrf.mxu1  ;;  %v456_v39 = vadd.f32 %v1268_v26, %v455_v27  ;;  %v476_v40 = vadd.f32 %v1268_v26, %v475_v28 }
  0xd4   : > { %v418_v33 = vadd.f32 %v1268_v26, %v417_v29  ;;  %v438_v34 = vadd.f32 %v1268_v26, %v437_v30 }
  0xd6   : > { %v799_v35 = vpack.c.bf16 %v418_v33, %v416_v31  ;;  %v819_v36 = vpack.c.bf16 %v438_v34, %v436_v32 }
  0xd8   : > { %800 = vst [vmem:[%s1276_s27] sm:$0xff] %v799_v35  }
  0xd9   : > { %879 = vst [vmem:[%s1276_s27 + $0x20] sm:$0xff] %v819_v36  }
  0xda   : > { %v457_v37 = vpop.f32.mrf.mxu2  ;;  %v477_v38 = vpop.f32.mrf.mxu3 }
  0xdb   : > { %v458_v41 = vadd.f32 %v1268_v26, %v457_v37  ;;  %v478_v42 = vadd.f32 %v1268_v26, %v477_v38  ;;  %v420_v43 = vpop.f32.mrf.mxu0  ;;  %v440_v44 = vpop.f32.mrf.mxu1 }
  0xdc   : > { %v421_v51 = vadd.f32 %v1268_v26, %v420_v43  ;;  %v441_v52 = vadd.f32 %v1268_v26, %v440_v44 }
  0xdd   : > { %v839_v45 = vpack.c.bf16 %v458_v41, %v456_v39  ;;  %v859_v46 = vpack.c.bf16 %v478_v42, %v476_v40 }
  0xdf   : > { %883 = vst [vmem:[%s1276_s27 + $0x40] sm:$0xff] %v839_v45  }
  0xe0   : > { %887 = vst [vmem:[%s1276_s27 + $0x60] sm:$0xff] %v859_v46  }
  0xe2   : > { %v460_v47 = vpop.f32.mrf.mxu2  ;;  %v480_v48 = vpop.f32.mrf.mxu3 }
  0xe3   : > { %v422_v49 = vpop.f32.mrf.mxu0  ;;  %v442_v50 = vpop.f32.mrf.mxu1  ;;  %v461_v59 = vadd.f32 %v1268_v26, %v460_v47  ;;  %v481_v60 = vadd.f32 %v1268_v26, %v480_v48 }
  0xe4   : > { %v423_v53 = vadd.f32 %v1268_v26, %v422_v49  ;;  %v443_v54 = vadd.f32 %v1268_v26, %v442_v50 }
  0xe6   : > { %v804_v55 = vpack.c.bf16 %v423_v53, %v421_v51  ;;  %v824_v56 = vpack.c.bf16 %v443_v54, %v441_v52 }
  0xe8   : > { %876 = vst [vmem:[%s1276_s27 + $0x8] sm:$0xff] %v804_v55  }
  0xe9   : > { %880 = vst [vmem:[%s1276_s27 + $0x28] sm:$0xff] %v824_v56  }
  0xea   : > { %v462_v57 = vpop.f32.mrf.mxu2  ;;  %v482_v58 = vpop.f32.mrf.mxu3 }
  0xeb   : > { %v463_v61 = vadd.f32 %v1268_v26, %v462_v57  ;;  %v483_v62 = vadd.f32 %v1268_v26, %v482_v58  ;;  %v425_v63 = vpop.f32.mrf.mxu0  ;;  %v445_v0 = vpop.f32.mrf.mxu1 }
  0xec   : > { %v426_v7 = vadd.f32 %v1268_v26, %v425_v63  ;;  %v446_v8 = vadd.f32 %v1268_v26, %v445_v0 }
  0xed   : > { %v844_v1 = vpack.c.bf16 %v463_v61, %v461_v59  ;;  %v864_v2 = vpack.c.bf16 %v483_v62, %v481_v60 }
  0xef   : > { %884 = vst [vmem:[%s1276_s27 + $0x48] sm:$0xff] %v844_v1  }
  0xf0   : > { %888 = vst [vmem:[%s1276_s27 + $0x68] sm:$0xff] %v864_v2  }
  0xf2   : > { %v465_v3 = vpop.f32.mrf.mxu2  ;;  %v485_v4 = vpop.f32.mrf.mxu3 }
  0xf3   : > { %v427_v5 = vpop.f32.mrf.mxu0  ;;  %v447_v6 = vpop.f32.mrf.mxu1  ;;  %v466_v15 = vadd.f32 %v1268_v26, %v465_v3  ;;  %v486_v16 = vadd.f32 %v1268_v26, %v485_v4 }
  0xf4   : > { %v428_v9 = vadd.f32 %v1268_v26, %v427_v5  ;;  %v448_v10 = vadd.f32 %v1268_v26, %v447_v6 }
  0xf6   : > { %v809_v11 = vpack.c.bf16 %v428_v9, %v426_v7  ;;  %v829_v12 = vpack.c.bf16 %v448_v10, %v446_v8 }
  0xf8   : > { %877 = vst [vmem:[%s1276_s27 + $0x10] sm:$0xff] %v809_v11  }
  0xf9   : > { %881 = vst [vmem:[%s1276_s27 + $0x30] sm:$0xff] %v829_v12  }
  0xfa   : > { %v467_v13 = vpop.f32.mrf.mxu2  ;;  %v487_v14 = vpop.f32.mrf.mxu3 }
  0xfb   : > { %v468_v17 = vadd.f32 %v1268_v26, %v467_v13  ;;  %v488_v18 = vadd.f32 %v1268_v26, %v487_v14  ;;  %v430_v19 = vpop.f32.mrf.mxu0  ;;  %v450_v20 = vpop.f32.mrf.mxu1 }
  0xfc   : > { %v431_v28 = vadd.f32 %v1268_v26, %v430_v19  ;;  %v451_v29 = vadd.f32 %v1268_v26, %v450_v20 }
  0xfd   : > { %v849_v21 = vpack.c.bf16 %v468_v17, %v466_v15  ;;  %v869_v22 = vpack.c.bf16 %v488_v18, %v486_v16 }
  0xff   : > { %885 = vst [vmem:[%s1276_s27 + $0x50] sm:$0xff] %v849_v21  }
 0x100   : > { %889 = vst [vmem:[%s1276_s27 + $0x70] sm:$0xff] %v869_v22  }
 0x102   : > { %v470_v23 = vpop.f32.mrf.mxu2  ;;  %v490_v24 = vpop.f32.mrf.mxu3 }
 0x103   : > { %v432_v25 = vpop.f32.mrf.mxu0  ;;  %v452_v27 = vpop.f32.mrf.mxu1  ;;  %v471_v36 = vadd.f32 %v1268_v26, %v470_v23  ;;  %v491_v37 = vadd.f32 %v1268_v26, %v490_v24 }
 0x104   : > { %v433_v30 = vadd.f32 %v1268_v26, %v432_v25  ;;  %v453_v31 = vadd.f32 %v1268_v26, %v452_v27 }
 0x106   : > { %v814_v32 = vpack.c.bf16 %v433_v30, %v431_v28  ;;  %v834_v33 = vpack.c.bf16 %v453_v31, %v451_v29 }
 0x108   : > { %878 = vst [vmem:[%s1276_s27 + $0x18] sm:$0xff] %v814_v32  }
 0x109   : > { %882 = vst [vmem:[%s1276_s27 + $0x38] sm:$0xff] %v834_v33  }
 0x10a   : > { %v472_v34 = vpop.f32.mrf.mxu2  ;;  %v492_v35 = vpop.f32.mrf.mxu3 }
 0x10b   : > { %v473_v38 = vadd.f32 %v1268_v26, %v472_v34  ;;  %v493_v39 = vadd.f32 %v1268_v26, %v492_v35 }
 0x10d   : > { %v854_v40 = vpack.c.bf16 %v473_v38, %v471_v36  ;;  %v874_v41 = vpack.c.bf16 %v493_v39, %v491_v37 }
 0x10f   : > { %886 = vst [vmem:[%s1276_s27 + $0x58] sm:$0xff] %v854_v40  }
 0x110   : > { %890 = vst [vmem:[%s1276_s27 + $0x78] sm:$0xff] %v874_v41  }
 0x111   : > { %1064 = shalt.err (!%p1061_p10)
}
 0x112   : > { %s1112_s6 = smov 64   ;;  %s1113_s25 = smov 4  }
 0x113   : > { %921 = dma.vmem_to_hbm [thread:$0]  (%p1203_p3), %s573_s24, 2048, %s575_s29, %s560_s16, %s1112_s6, %s1112_s6, %s1113_s25  }
 0x114 PF: > { %s589_s18 = sand.u32 1, %s1095_s12   ;;  %p1365_p12 = scmp.ge.s32.totalorder %s1107_s15, 2 }
 0x115   : > { %s590_s23 = scalar_lea.sflag [#allocation4], %s589_s18 }
 0x116   : > { %p932_p13 = pnand %p1365_p12, %p1169_p6 }
 0x118   : > { %p933_p0 = pneg %p932_p13 }
 0x11a   : > { %1090 = dma.done.wait (%p933_p0), %s590_s23, 2048  }
 0x11b   : > { %1092 = vsyncadd (%p933_p0), %s590_s23, 4294965248  ;;  %p17_p5 = scmp.ge.s32.totalorder %s1187_s26, 4   ;;  %s1366_s12 = smov %s1099_s13 }
 0x11c   : > { %s1367_s13 = smov %s1103_s14  ;;  %s1368_s14 = smov %s1199_s4 }
 0x11d   : > { %s1369_s15 = smov %s1187_s26  ;;  %19 = sbr.rel (!%p17_p5) target bundleno = 6 (0x6), region = 81 }
 0x122   :  { %596 = vsyncpa [#allocation3], 1 }
 0x123   :  { %598 = vsyncpa [#allocation3 + $0x1], 1 }
 0x124   :  { %599 = vsyncpa [#allocation6], 1 }
 0x125   :  { %600 = vsyncpa [#allocation4], 1 }
 0x126   :  { %602 = vsyncpa [#allocation4 + $0x1], 1 }

</bundles_post_ra>
